<compile_context>
chip_gen: v7x
topology: tpu7x:2x2x1
jax: 0.10.0
libtpu: 0.0.40
codegen_flags: <defaults>
</compile_context>

<pallas_src>
import functools

import jax
import jax.numpy as jnp
from jax.experimental import pallas as pl
from jax.experimental.pallas import tpu as pltpu


_BLOCK_BYTES_TARGET = 2 * 1024 * 1024  # per-input-block budget (double-buffered by Pallas)


def _gap_kernel(x_ref, o_ref, acc_ref, *, inv_hw):
    # x_ref: (1, hw_tile, c_tile)  -- C on the lane axis, HW on the sublane axis
    # o_ref: (1, 1, c_tile)        -- lane-dense output slab
    # acc_ref: (1, 1, c_tile) f32  -- resident accumulator across the HW (reduction) axis
    k = pl.program_id(2)

    @pl.when(k == 0)
    def _init():
        acc_ref[...] = jnp.zeros_like(acc_ref)

    x = x_ref[...].astype(jnp.float32)                       # accumulate in f32
    acc_ref[...] += jnp.sum(x, axis=1, keepdims=True)        # sublane-axis reduction

    @pl.when(k == pl.num_programs(2) - 1)
    def _finalize():
        o_ref[...] = (acc_ref[...] * inv_hw).astype(o_ref.dtype)


def _largest_divisor_multiple(total, quantum, cap):
    """Largest t <= cap with t % quantum == 0 and total % t == 0; None if not found."""
    t = (min(cap, total) // quantum) * quantum
    while t >= quantum:
        if total % t == 0:
            return t
        t -= quantum
    return None


def squeeze_gap(x, *, hw_tile=None, c_tile=None):
    """Global average pool: (N, C, H, W) -> (N, C, 1, 1). Matches nn.AdaptiveAvgPool2d((1,1))."""
    N, C, H, W = x.shape
    HW = H * W
    itemsize = jnp.dtype(x.dtype).itemsize

    # ---- wrapper-side layout plumbing: NCHW -> (N, HW, C), C lane-dense -------------
    x_l = jnp.transpose(x, (0, 2, 3, 1)).reshape(N, HW, C)

    # ---- tile selection ---------------------------------------------------------------
    if c_tile is None:
        if C % 128 == 0:
            c_tile = _largest_divisor_multiple(C, 128, 1280) or C
        else:
            c_tile = C  # full-extent last dim (allowed even if < 128)
    assert C % c_tile == 0, (C, c_tile)

    if hw_tile is None:
        budget_elems = max(8, _BLOCK_BYTES_TARGET // (c_tile * itemsize))
        if HW <= budget_elems:
            hw_tile = HW
        else:
            hw_tile = _largest_divisor_multiple(HW, 8, budget_elems) or HW
    assert HW % hw_tile == 0, (HW, hw_tile)

    grid = (N, C // c_tile, HW // hw_tile)

    # ---- explicit scoped-VMEM budget for the chosen tiles -------------------------------
    in_block_bytes = hw_tile * c_tile * itemsize
    out_block_bytes = c_tile * itemsize
    acc_bytes = c_tile * 4
    vmem_need = 2 * in_block_bytes + 2 * out_block_bytes + acc_bytes
    vmem_limit = int(min(48 * 1024 * 1024, max(16 * 1024 * 1024, 4 * vmem_need)))

    kernel = functools.partial(_gap_kernel, inv_hw=float(1.0 / HW))

    out = pl.pallas_call(
        kernel,
        out_shape=jax.ShapeDtypeStruct((N, 1, C), x.dtype),
        grid=grid,
        in_specs=[pl.BlockSpec((1, hw_tile, c_tile), lambda n, cj, k: (n, k, cj))],
        out_specs=pl.BlockSpec((1, 1, c_tile), lambda n, cj, k: (n, 0, cj)),
        scratch_shapes=[pltpu.VMEM((1, 1, c_tile), jnp.float32)],
        compiler_params=pltpu.CompilerParams(
            dimension_semantics=("parallel", "parallel", "arbitrary"),
            vmem_limit_bytes=vmem_limit,
        ),
    )(x_l)

    return out.reshape(N, C, 1, 1)


if __name__ == "__main__":
    key = jax.random.PRNGKey(0)

    # --- test 1: small shape consistent with the module (auto tiles, single grid step) ---
    N, C, H, W = 2, 4, 16, 16
    k1, k2, k3 = jax.random.split(key, 3)
    x = jax.random.normal(k1, (N, C, H, W), dtype=jnp.float32)
    out = jax.block_until_ready(squeeze_gap(x))
    ref = jnp.mean(x, axis=(2, 3), keepdims=True)
    assert out.shape == (N, C, 1, 1), out.shape
    assert jnp.allclose(out, ref, atol=1e-5, rtol=1e-5), "mismatch vs reference (test 1)"

    # --- test 2: lane-dense channels + forced tiling to exercise the accumulator path ---
    N2, C2, H2, W2 = 2, 256, 16, 16
    x2 = jax.random.normal(k2, (N2, C2, H2, W2), dtype=jnp.float32)
    out2 = jax.block_until_ready(squeeze_gap(x2, hw_tile=64, c_tile=128))  # grid=(2,2,4)
    ref2 = jnp.mean(x2, axis=(2, 3), keepdims=True)
    assert out2.shape == (N2, C2, 1, 1), out2.shape
    assert jnp.allclose(out2, ref2, atol=1e-5, rtol=1e-5), "mismatch vs reference (test 2)"

    # --- test 3: bf16 activations (f32 accumulation inside the kernel) -------------------
    x3 = jax.random.normal(k3, (N2, C2, H2, W2), dtype=jnp.bfloat16)
    out3 = jax.block_until_ready(squeeze_gap(x3))
    ref3 = jnp.mean(x3.astype(jnp.float32), axis=(2, 3), keepdims=True).astype(jnp.bfloat16)
    assert out3.dtype == jnp.bfloat16
    assert jnp.allclose(out3.astype(jnp.float32), ref3.astype(jnp.float32),
                        atol=1e-2, rtol=1e-2), "mismatch vs reference (test 3)"

    print("KERNEL_OK")
</pallas_src>

<mosaic_0001>
module attributes {stable_mosaic.version = 11 : i64} {
  func.func @_gap_kernel(%arg0: i32, %arg1: i32, %arg2: i32, %arg3: memref<1x256x4xf32, #tpu.memory_space<vmem>>, %arg4: memref<1x1x4xf32, #tpu.memory_space<vmem>>, %arg5: memref<1x1x4xf32, #tpu.memory_space<vmem>>) attributes {dimension_semantics = [#tpu.dimension_semantics<parallel>, #tpu.dimension_semantics<parallel>, #tpu.dimension_semantics<arbitrary>], iteration_bounds = array<i64: 2, 1, 1>, scalar_prefetch = 0 : i64, scratch_operands = 1 : i64, tpu.core_type = #tpu.core_type<tc>, window_params = [{transform_indices = @transform_0, window_bounds = array<i64: 1, 256, 4>}, {transform_indices = @transform_1, window_bounds = array<i64: 1, 1, 4>}]} {
    %c0_i32 = arith.constant 0 : i32
    %0 = arith.cmpi eq, %arg2, %c0_i32 : i32
    %1 = arith.extui %0 : i1 to i32
    %c0_i32_0 = arith.constant 0 : i32
    %2 = arith.cmpi ne, %1, %c0_i32_0 : i32
    scf.if %2 {
      %cst_11 = arith.constant 0.000000e+00 : f32
      %12 = vector.broadcast %cst_11 : f32 to vector<1x1x4xf32>
      %c0_12 = arith.constant 0 : index
      %c0_13 = arith.constant 0 : index
      %c0_14 = arith.constant 0 : index
      %13 = vector.load %arg5[%c0_12, %c0_13, %c0_14] : memref<1x1x4xf32, #tpu.memory_space<vmem>>, vector<1x1x4xf32>
      tpu.vector_store %arg5[%c0_12, %c0_13, %c0_14], %12 {strides = array<i32>} : memref<1x1x4xf32, #tpu.memory_space<vmem>>, vector<1x1x4xf32>,
    } else {
    }
    %c0 = arith.constant 0 : index
    %c0_1 = arith.constant 0 : index
    %c0_2 = arith.constant 0 : index
    %3 = vector.load %arg3[%c0, %c0_1, %c0_2] : memref<1x256x4xf32, #tpu.memory_space<vmem>>, vector<1x256x4xf32>
    %c0_3 = arith.constant 0 : index
    %c0_4 = arith.constant 0 : index
    %c0_5 = arith.constant 0 : index
    %4 = vector.load %arg5[%c0_3, %c0_4, %c0_5] : memref<1x1x4xf32, #tpu.memory_space<vmem>>, vector<1x1x4xf32>
    %cst = arith.constant dense<0.000000e+00> : vector<1x4xf32>
    %5 = vector.multi_reduction <add>, %3, %cst [1] : vector<1x256x4xf32> to vector<1x4xf32>
    %6 = vector.shape_cast %5 : vector<1x4xf32> to vector<1x1x4xf32>
    %7 = arith.addf %4, %6 : vector<1x1x4xf32>
    %c0_6 = arith.constant 0 : index
    %c0_7 = arith.constant 0 : index
    %c0_8 = arith.constant 0 : index
    %8 = vector.load %arg5[%c0_6, %c0_7, %c0_8] : memref<1x1x4xf32, #tpu.memory_space<vmem>>, vector<1x1x4xf32>
    tpu.vector_store %arg5[%c0_6, %c0_7, %c0_8], %7 {strides = array<i32>} : memref<1x1x4xf32, #tpu.memory_space<vmem>>, vector<1x1x4xf32>,
    %c0_i32_9 = arith.constant 0 : i32
    %9 = arith.cmpi eq, %arg2, %c0_i32_9 : i32
    %10 = arith.extui %9 : i1 to i32
    %c0_i32_10 = arith.constant 0 : i32
    %11 = arith.cmpi ne, %10, %c0_i32_10 : i32
    scf.if %11 {
      %c0_11 = arith.constant 0 : index
      %c0_12 = arith.constant 0 : index
      %c0_13 = arith.constant 0 : index
      %12 = vector.load %arg5[%c0_11, %c0_12, %c0_13] : memref<1x1x4xf32, #tpu.memory_space<vmem>>, vector<1x1x4xf32>
      %cst_14 = arith.constant 3.906250e-03 : f32
      %13 = vector.broadcast %cst_14 : f32 to vector<1x1x4xf32>
      %14 = arith.mulf %12, %13 : vector<1x1x4xf32>
      %c0_15 = arith.constant 0 : index
      %c0_16 = arith.constant 0 : index
      %c0_17 = arith.constant 0 : index
      %15 = vector.load %arg4[%c0_15, %c0_16, %c0_17] : memref<1x1x4xf32, #tpu.memory_space<vmem>>, vector<1x1x4xf32>
      tpu.vector_store %arg4[%c0_15, %c0_16, %c0_17], %14 {strides = array<i32>} : memref<1x1x4xf32, #tpu.memory_space<vmem>>, vector<1x1x4xf32>,
    } else {
    }
    return
  }
  func.func @transform_0(%arg0: i32, %arg1: i32, %arg2: i32) -> (i32, i32, i32) {
    %c0_i32 = arith.constant 0 : i32
    return %arg0, %arg2, %arg1 : i32, i32, i32
  }
  func.func @transform_1(%arg0: i32, %arg1: i32, %arg2: i32) -> (i32, i32, i32) {
    %c0_i32 = arith.constant 0 : i32
    %c0_i32_0 = arith.constant 0 : i32
    return %arg0, %c0_i32, %arg1 : i32, i32, i32
  }
}

</mosaic_0001>

<bundles_post_ra>
// kernel: tpu_custom_call.1
= control target key start
LH: loop header
LB: loop body
LE: loop exit
PB: predicated region body
PF: predicated region fallthrough
CT: control target
= control target key end

     0   :  { %6 = vsyncpa [#allocation4], 0  ;;  %s710_s0 = inlined_call_operand.vmem [shape: f32[2,256,4], index: 0, kind: input, shape index: {}]   ;;  %s711_s1 = inlined_call_operand.hbm [shape: f32[2,1,4], index: 1, kind: output, shape index: {}]  }
   0x1   :  { %8 = vsyncpa [#allocation4 + $0x1], 0  ;;  %s529_s6 = smov 0   ;;  %s531_s7 = smov 0  }
   0x2   :  { %s533_s8 = smov 0   ;;  %s535_s9 = smov 0  }
   0x3   :  { %s537_s10 = smov 0   ;;  %s539_s11 = smov 0  }
   0x4 LB: > { %s370_s12 = sadd.s32 4294967295, %s515_s11   ;;  %s371_s13 = sadd.s32 4294967294, %s515_s11   ;;  %s515_s11 = sphi %s539_s11, %s14_s11   ;;  %s511_s10 = sphi %s537_s10, %s718_s10   ;;  %s507_s9 = sphi %s535_s9, %s717_s9   ;;  %s503_s8 = sphi %s533_s8, %s716_s8   ;;  %s499_s7 = sphi %s531_s7, %s715_s7   ;;  %s495_s6 = sphi %s529_s6, %s714_s6  }
   0x5   : > { %s33_s14 = sadd.s32 1, %s511_s10  ;;  %s72_s15 = sadd.s32 1, %s503_s8 }
   0x6   : > { %p35_p0 = scmp.ge.s32.totalorder %s33_s14, 2  ;;  %p82_p1 = scmp.ne.s32.totalorder %s503_s8, %s499_s7 }
   0x7   : > { %p83_p2 = scmp.eq.s32.totalorder %s370_s12, 1  ;;  %p88_p3 = scmp.ne.s32.totalorder %s499_s7, %s495_s6 }
   0x8   : > { %s720_s14 = smov (%p35_p0, %s33_s14), 0  ;;  %p89_p5 = scmp.eq.s32.totalorder %s371_s13, 1 }
   0x9   : > { %p569_p4 = por %p83_p2, %p82_p1  ;;  %s67_s17 = ssub.s32 %s511_s10, %s720_s14 }
   0xa   : > { %p374_p6 = scmp.ge.s32.totalorder %s515_s11, 1  ;;  %p70_p7 = scmp.eq.s32.totalorder %s67_s17, 0 }
   0xb   : > { %p576_p8 = por %p89_p5, %p88_p3  ;;  %p123_p9 = scmp.lt.s32.totalorder %s515_s11, 3 }
   0xc   : > { %s582_s19 = scalar_select %p70_p7, %s503_s8, %s72_s15  }
   0xd   : > { %p124_p10 = pnand %p374_p6, %p123_p9 }
   0xe   : > { %vm166_vm0 = vcmask (!%p124_p10), 24576   ;;  %p150_p11 = scmp.lt.s32.totalorder (!%p124_p10), %s507_s9, 1  ;;  %v517_v0 = vmov (!%p124_p10), 0.0   ;;  %vm201_vm1 = vcmask (!%p124_p10), 31744   ;;  %s147_s25 = sand.u32 (!%p124_p10), 1, %s499_s7  }
   0xf   : > { %127 = sbr.rel (%p124_p10) target bundleno = 128 (0x80), region = 24  ;;  %167 = vst.msk [vmem:[#allocation2] sm:$0x1] (!%p124_p10), %vm166_vm0, %v517_v0  ;;  %s148_s26 = scalar_lea.vmem (!%p124_p10), [#allocation3], %s147_s25 }
  0x10   : > { %s294_s27 = sshll.u32 (!%p124_p10), %s148_s26, 4  ;;  %s377_s28 = sshll.u32 (!%p124_p10), %s507_s9, 4  ;;  %s659_s27 = int_to_ptr.vmem [resolvable:$true] %s294_s27 }
  0x11   : > { %s664_s2 = scalar_lea.hbm (!%p124_p10), %s711_s1, %s377_s28  ;;  %s281_s3 = scalar_lea.sflag (!%p124_p10), [#allocation4], %s147_s25 }
  0x12   : > { %s437_s4 = scalar_lea.vmem (!%p124_p10), %s659_s27, 16  ;;  %s518_s5 = smov (!%p124_p10), [#allocation3]  }
  0x13   : > { %p438_p12 = scmp.ne.s32.totalorder (!%p124_p10), %s659_s27, %s437_s4 }
  0x15   : > { %p439_p13 = pnand (!%p124_p10), %p438_p12, %p569_p4 }
  0x16   : > { %s151_s20 = scalar_select %p150_p11, %s507_s9, 1 }
  0x17   : > { %p440_p0 = pneg %p439_p13  ;;  %s441_s9 = sshll.u32 %s518_s5, 4  ;;  %s442_s9 = int_to_ptr.vmem [resolvable:$false] %s441_s9 }
  0x18   : > { %s380_s21 = sshll.u32 %s151_s20, 8  ;;  %s443_s12 = scalar_lea.vmem %s442_s9, 32 }
  0x19   : > { %s590_s24 = scalar_lea.vmem %s710_s0, %s380_s21  ;;  %p444_p1 = scmp.lt.s32.totalorder %s659_s27, %s442_s9 }
  0x1a   : > { %v168_v1 = vld [vmem:[%s590_s24] sm:$0xff]  ;;  %v169_v2 = vld [vmem:[%s590_s24 + $0x8] sm:$0xff]  ;;  %v170_v3 = vld [vmem:[%s590_s24 + $0x10] sm:$0xff]  ;;  %p445_p2 = scmp.lt.s32.totalorder %s443_s12, %s437_s4 }
  0x1b   : > { %v171_v4 = vld [vmem:[%s590_s24 + $0x18] sm:$0xff]  ;;  %v202_v5 = vsel %vm201_vm1, %v168_v1, 0.0  ;;  %v203_v6 = vsel %vm201_vm1, %v169_v2, 0.0  ;;  %v205_v7 = vsel %vm201_vm1, %v170_v3, 0.0  ;;  %v172_v8 = vld [vmem:[%s590_s24 + $0x20] sm:$0xff]  ;;  %v173_v11 = vld [vmem:[%s590_s24 + $0x28] sm:$0xff] }
  0x1c   : > { %v204_v9 = vadd.f32 %v203_v6, %v202_v5  ;;  %v207_v10 = vsel %vm201_vm1, %v171_v4, 0.0  ;;  %v209_v13 = vsel %vm201_vm1, %v172_v8, 0.0  ;;  %v174_v14 = vld [vmem:[%s590_s24 + $0x30] sm:$0xff]  ;;  %v211_v16 = vsel %vm201_vm1, %v173_v11, 0.0  ;;  %v175_v17 = vld [vmem:[%s590_s24 + $0x38] sm:$0xff]  ;;  %v176_v20 = vld [vmem:[%s590_s24 + $0x40] sm:$0xff]  ;;  %p446_p3 = por %p445_p2, %p444_p1 }
  0x1d   : > { %v213_v19 = vsel %vm201_vm1, %v174_v14, 0.0  ;;  %v215_v22 = vsel %vm201_vm1, %v175_v17, 0.0  ;;  %v177_v23 = vld [vmem:[%s590_s24 + $0x48] sm:$0xff]  ;;  %v217_v25 = vsel %vm201_vm1, %v176_v20, 0.0  ;;  %v178_v26 = vld [vmem:[%s590_s24 + $0x50] sm:$0xff]  ;;  %v179_v29 = vld [vmem:[%s590_s24 + $0x58] sm:$0xff] }
  0x1e   : > { %v206_v12 = vadd.f32 %v205_v7, %v204_v9  ;;  %v219_v28 = vsel %vm201_vm1, %v177_v23, 0.0  ;;  %v221_v31 = vsel %vm201_vm1, %v178_v26, 0.0  ;;  %v180_v32 = vld [vmem:[%s590_s24 + $0x60] sm:$0xff]  ;;  %v223_v34 = vsel %vm201_vm1, %v179_v29, 0.0  ;;  %v181_v35 = vld [vmem:[%s590_s24 + $0x68] sm:$0xff]  ;;  %v182_v38 = vld [vmem:[%s590_s24 + $0x70] sm:$0xff]  ;;  %p447_p5 = pnand %p446_p3, %p440_p0 }
  0x1f   : > { %v225_v37 = vsel %vm201_vm1, %v180_v32, 0.0  ;;  %v227_v40 = vsel %vm201_vm1, %v181_v35, 0.0  ;;  %v183_v41 = vld [vmem:[%s590_s24 + $0x78] sm:$0xff]  ;;  %v229_v43 = vsel %vm201_vm1, %v182_v38, 0.0  ;;  %v184_v44 = vld [vmem:[%s590_s24 + $0x80] sm:$0xff]  ;;  %v185_v47 = vld [vmem:[%s590_s24 + $0x88] sm:$0xff] }
  0x20   : > { %v208_v15 = vadd.f32 %v207_v10, %v206_v12  ;;  %v231_v46 = vsel %vm201_vm1, %v183_v41, 0.0  ;;  %v233_v49 = vsel %vm201_vm1, %v184_v44, 0.0  ;;  %v186_v50 = vld [vmem:[%s590_s24 + $0x90] sm:$0xff]  ;;  %v235_v52 = vsel %vm201_vm1, %v185_v47, 0.0  ;;  %v187_v53 = vld [vmem:[%s590_s24 + $0x98] sm:$0xff]  ;;  %v188_v56 = vld [vmem:[%s590_s24 + $0xa0] sm:$0xff] }
  0x21   : > { %v237_v55 = vsel %vm201_vm1, %v186_v50, 0.0  ;;  %v239_v58 = vsel %vm201_vm1, %v187_v53, 0.0  ;;  %v189_v59 = vld [vmem:[%s590_s24 + $0xa8] sm:$0xff]  ;;  %v241_v61 = vsel %vm201_vm1, %v188_v56, 0.0  ;;  %v190_v62 = vld [vmem:[%s590_s24 + $0xb0] sm:$0xff]  ;;  %v191_v1 = vld [vmem:[%s590_s24 + $0xb8] sm:$0xff] }
  0x22   : > { %v210_v18 = vadd.f32 %v209_v13, %v208_v15  ;;  %v243_v0 = vsel %vm201_vm1, %v189_v59, 0.0  ;;  %v245_v3 = vsel %vm201_vm1, %v190_v62, 0.0  ;;  %v192_v4 = vld [vmem:[%s590_s24 + $0xc0] sm:$0xff]  ;;  %v247_v6 = vsel %vm201_vm1, %v191_v1, 0.0  ;;  %v193_v7 = vld [vmem:[%s590_s24 + $0xc8] sm:$0xff]  ;;  %v194_v10 = vld [vmem:[%s590_s24 + $0xd0] sm:$0xff] }
  0x23   : > { %v249_v9 = vsel %vm201_vm1, %v192_v4, 0.0  ;;  %v251_v12 = vsel %vm201_vm1, %v193_v7, 0.0  ;;  %v195_v13 = vld [vmem:[%s590_s24 + $0xd8] sm:$0xff]  ;;  %v253_v15 = vsel %vm201_vm1, %v194_v10, 0.0 }
  0x24   : > { %v212_v21 = vadd.f32 %v211_v16, %v210_v18  ;;  %v196_v16 = vld [vmem:[%s590_s24 + $0xe0] sm:$0xff]  ;;  %v255_v18 = vsel %vm201_vm1, %v195_v13, 0.0 }
  0x26   : > { %v214_v24 = vadd.f32 %v213_v19, %v212_v21  ;;  %v197_v19 = vld [vmem:[%s590_s24 + $0xe8] sm:$0xff]  ;;  %v257_v21 = vsel %vm201_vm1, %v196_v16, 0.0 }
  0x28   : > { %v216_v27 = vadd.f32 %v215_v22, %v214_v24  ;;  %v198_v22 = vld [vmem:[%s590_s24 + $0xf0] sm:$0xff]  ;;  %v259_v24 = vsel %vm201_vm1, %v197_v19, 0.0 }
  0x2a   : > { %v218_v30 = vadd.f32 %v217_v25, %v216_v27  ;;  %v199_v25 = vld [vmem:[%s590_s24 + $0xf8] sm:$0xff]  ;;  %v261_v27 = vsel %vm201_vm1, %v198_v22, 0.0 }
  0x2b   : > { %v263_v29 = vsel %vm201_vm1, %v199_v25, 0.0 }
  0x2c   : > { %v220_v33 = vadd.f32 %v219_v28, %v218_v30 }
  0x2e   : > { %v222_v36 = vadd.f32 %v221_v31, %v220_v33 }
  0x30   : > { %v224_v39 = vadd.f32 %v223_v34, %v222_v36 }
  0x32   : > { %v226_v42 = vadd.f32 %v225_v37, %v224_v39  ;;  %v200_v37 = vld [vmem:[#allocation2] sm:$0x1] }
  0x34   : > { %v228_v45 = vadd.f32 %v227_v40, %v226_v42 }
  0x36   : > { %v230_v48 = vadd.f32 %v229_v43, %v228_v45 }
  0x38   : > { %v232_v51 = vadd.f32 %v231_v46, %v230_v48 }
  0x3a   : > { %v234_v54 = vadd.f32 %v233_v49, %v232_v51 }
  0x3c   : > { %v236_v57 = vadd.f32 %v235_v52, %v234_v54 }
  0x3e   : > { %v238_v60 = vadd.f32 %v237_v55, %v236_v57 }
  0x40   : > { %v240_v63 = vadd.f32 %v239_v58, %v238_v60 }
  0x42   : > { %v242_v2 = vadd.f32 %v241_v61, %v240_v63 }
  0x44   : > { %v244_v5 = vadd.f32 %v243_v0, %v242_v2 }
  0x46   : > { %v246_v8 = vadd.f32 %v245_v3, %v244_v5 }
  0x48   : > { %v248_v11 = vadd.f32 %v247_v6, %v246_v8 }
  0x4a   : > { %v250_v14 = vadd.f32 %v249_v9, %v248_v11 }
  0x4c   : > { %v252_v17 = vadd.f32 %v251_v12, %v250_v14 }
  0x4e   : > { %v254_v20 = vadd.f32 %v253_v15, %v252_v17 }
  0x50   : > { %v256_v23 = vadd.f32 %v255_v18, %v254_v20 }
  0x52   : > { %v258_v26 = vadd.f32 %v257_v21, %v256_v23 }
  0x54   : > { %v260_v28 = vadd.f32 %v259_v24, %v258_v26 }
  0x56   : > { %v262_v30 = vadd.f32 %v261_v27, %v260_v28 }
  0x58   : > { %v264_v31 = vadd.f32 %v263_v29, %v262_v30 }
  0x5a   : > { %v265_v32 = vrot.slane %v264_v31, 4 }
  0x5c   : > { %v266_v33 = vadd.f32 %v265_v32, %v264_v31 }
  0x5e   : > { %v267_v34 = vrot.slane %v266_v33, 2 }
  0x60   : > { %v268_v35 = vadd.f32 %v267_v34, %v266_v33 }
  0x62   : > { %v269_v36 = vrot.slane %v268_v35, 1 }
  0x64   : > { %v270_v38 = vadd.f32 %v269_v36, %v268_v35 }
  0x66   : > { %v271_v39 = vadd.f32 %v270_v38, %v200_v37 }
  0x68   : > { %273 = vst.msk [vmem:[#allocation2] sm:$0x1] %vm166_vm0, %v271_v39 }
  0x6f   : > { %v277_v40 = vld [vmem:[#allocation2] sm:$0x1] }
  0x70   : > { %v278_v41 = vmul.f32 0.00390625, %v277_v40 }
  0x72   : > { %279 = vst.msk [vmem:[%s148_s26] sm:$0x1] %vm166_vm0, %v278_v41 }
  0x73   : > { %450 = shalt.err (!%p447_p5)
}
  0x74   : > { %s451_s13 = scalar_lea.hbm %s664_s2, 16  ;;  %s455_s20 = scalar_lea.hbm %s711_s1, 32 }
  0x75   : > { %p452_p6 = scmp.ne.s32.totalorder %s664_s2, %s451_s13  ;;  %p456_p10 = scmp.lt.u32.totalorder %s664_s2, %s711_s1 }
  0x76   : > { %p457_p11 = scmp.lt.u32.totalorder %s455_s20, %s451_s13  ;;  %p459_p13 = scmp.lt.u32.totalorder %s451_s13, %s664_s2 }
  0x77   : > { %p453_p7 = pnand %p452_p6, %p569_p4 }
  0x78   : > { %p458_p12 = por %p457_p11, %p456_p10 }
  0x79   : > { %p454_p9 = pneg %p453_p7 }
  0x7a   : > { %p460_p0 = por %p459_p13, %p458_p12 }
  0x7c   : > { %p461_p1 = pnand %p460_p0, %p454_p9 }
  0x7e   : > { %464 = shalt.err (!%p461_p1)
}
  0x7f   : > { %381 = dma.vmem_to_hbm [thread:$0]  (%p569_p4), %s659_s27, 16, %s664_s2, %s281_s3  }
  0x80 PF: > { %p387_p2 = scmp.ge.s32.totalorder %s515_s11, 2  ;;  %s306_s23 = sand.u32 1, %s495_s6  }
  0x81   : > { %s307_s24 = scalar_lea.sflag [#allocation4], %s306_s23 }
  0x82   : > { %p384_p3 = pnand %p387_p2, %p576_p8 }
  0x84   : > { %490 = dma.done.wait (!%p384_p3), %s307_s24, 16  }
  0x85   : > { %492 = vsyncadd (!%p384_p3), %s307_s24, 4294967280  ;;  %s14_s11 = sadd.s32 1, %s515_s11   ;;  %s714_s6 = smov %s499_s7 }
  0x86   : > { %p11_p5 = scmp.ge.s32.totalorder %s14_s11, 4   ;;  %s715_s7 = smov %s503_s8 }
  0x87   : > { %s716_s8 = smov %s582_s19  ;;  %s717_s9 = smov %s511_s10 }
  0x88   : > { %s718_s10 = smov %s720_s14  ;;  %13 = sbr.rel (!%p11_p5) target bundleno = 4 (0x4), region = 67 }
  0x8f   :  { %311 = vsyncpa [#allocation4], 1 }
  0x90   :  { %313 = vsyncpa [#allocation4 + $0x1], 1 }

</bundles_post_ra>
